<compile_context>
chip_gen: v7x
topology: tpu7x:2x2x1
jax: 0.10.0
libtpu: 0.0.40
codegen_flags: <defaults>
</compile_context>

<pallas_src>
import functools

import jax
import jax.numpy as jnp
from jax.experimental import pallas as pl
from jax.experimental.pallas import tpu as pltpu

LRELU_SLOPE = 0.2
MATMUL_DTYPE = jnp.bfloat16   # MXU operand dtype; accumulation stays float32


def _round_up(n, m):
    return ((n + m - 1) // m) * m


def _default_epi_dtype():
    """bf16 epilogue on v6e/v7x; f32 on v5x (no bf16 VPU)."""
    try:
        kind = jax.devices()[0].device_kind.lower()
    except Exception:
        kind = ""
    return jnp.float32 if "v5" in kind else jnp.bfloat16


# ------------------------------ Pallas kernel ------------------------------ #

def _zdisc_kernel(x_ref, w1_ref, b1_ref, w2_ref, b2_ref, w3_ref, b3_ref, o_ref,
                  *, epi_dtype):
    """Fused 3-layer MLP over one (tm, z_size) batch tile -> (1, tm) probs."""
    lrelu = lambda v: jnp.maximum(v, LRELU_SLOPE * v)   # 2 VALU ops / element

    x = x_ref[...].astype(MATMUL_DTYPE)                 # (tm, Kz) bf16

    # linear1 + leaky_relu   (MXU bf16 operands, f32 accumulation, epi_dtype epilogue)
    z1 = jnp.dot(x, w1_ref[...], preferred_element_type=jnp.float32)
    h1 = lrelu(z1.astype(epi_dtype) + b1_ref[...].astype(epi_dtype))
    h1 = h1.astype(MATMUL_DTYPE)

    # linear2 + leaky_relu
    z2 = jnp.dot(h1, w2_ref[...], preferred_element_type=jnp.float32)
    h2 = lrelu(z2.astype(epi_dtype) + b2_ref[...].astype(epi_dtype))
    h2 = h2.astype(MATMUL_DTYPE)

    # linear3 (d -> 1) + sigmoid, computed as w3 @ h2^T so the per-row logits
    # come out LANE-dense as a (1, tm) row (unmasked output stores).  w3 is
    # pre-padded to (8, d) with the real weights in row 0.
    zz = jnp.einsum("od,td->ot", w3_ref[...], h2,
                    preferred_element_type=jnp.float32)          # (8, tm) f32
    z3 = zz[0:1, :] + b3_ref[0]                                  # (1, tm)
    o_ref[...] = jax.nn.sigmoid(z3)


# --------------------------------- wrapper --------------------------------- #

@functools.partial(jax.jit, static_argnames=("tile_m", "epi_dtype"))
def zdiscriminator_forward(x, packed, tile_m=1024, epi_dtype=None):
    """x: (B, z_size) float32 -> (B, 1) float32 probabilities."""
    if epi_dtype is None:
        epi_dtype = _default_epi_dtype()

    B, Kz = x.shape
    D = packed["w2"].shape[0]

    # Tile selection: big tiles (amortize per-step overhead + MXU RHS pushes),
    # but keep >= 2 grid steps for large B so v7x's two TensorCores both work.
    tm = max(128, min(int(tile_m), _round_up(pl.cdiv(B, 2), 128)))
    num_tiles = pl.cdiv(B, tm)          # ragged last tile; no wrapper pad

    out = pl.pallas_call(
        functools.partial(_zdisc_kernel, epi_dtype=epi_dtype),
        out_shape=jax.ShapeDtypeStruct((num_tiles, tm), jnp.float32),
        grid_spec=pltpu.PrefetchScalarGridSpec(
            num_scalar_prefetch=0,
            grid=(num_tiles,),
            in_specs=[
                pl.BlockSpec((tm, Kz), lambda i: (i, 0)),           # x tile
                pl.BlockSpec((Kz, D), lambda i: (0, 0)),            # w1 (resident)
                pl.BlockSpec((1, D), lambda i: (0, 0)),             # b1
                pl.BlockSpec((D, D), lambda i: (0, 0)),             # w2 (resident)
                pl.BlockSpec((1, D), lambda i: (0, 0)),             # b2
                pl.BlockSpec((8, D), lambda i: (0, 0)),             # w3 (row-0 real)
                pl.BlockSpec(memory_space=pltpu.MemorySpace.SMEM),  # b3 scalar
            ],
            out_specs=pl.BlockSpec((1, tm), lambda i: (i, 0)),      # lane-dense
        ),
        compiler_params=pltpu.CompilerParams(
            dimension_semantics=("parallel",)),
    )(x, packed["w1"], packed["b1"], packed["w2"], packed["b2"],
      packed["w3"], packed["b3"])

    # (num_tiles, tm) -> (B, 1); reshape is a free relabel, slice drops padding.
    return out.reshape(-1, 1)[:B]


# ------------------------------ params / ref ------------------------------- #

def init_params(key, z_size=32, d=128, std=0.02):
    """Canonical f32 params mirroring normal_init(m, 0.0, 0.02) on nn.Linear.

    PyTorch stores Linear weights as (out, in); we keep GEMM-layout (in, out).
    Biases get a tiny random value (normal_init would zero them) purely so the
    bias-add path is numerically exercised.
    """
    ks = jax.random.split(key, 6)
    f32 = jnp.float32

    def lin_w(k, n_in, n_out):
        return (std * jax.random.normal(k, (n_out, n_in), f32)).T   # (in, out)

    return {
        "w1": lin_w(ks[0], z_size, d),                       # (z, d)
        "b1": std * jax.random.normal(ks[1], (d,), f32),
        "w2": lin_w(ks[2], d, d),                            # (d, d)
        "b2": std * jax.random.normal(ks[3], (d,), f32),
        "w3": lin_w(ks[4], d, 1),                            # (d, 1)
        "b3": std * jax.random.normal(ks[5], (1,), f32),
    }


def pack_params(params):
    """One-time cast/layout for the kernel: bf16 weights & (1,d) biases,
    (8,d) zero-padded w3 row (real weights in row 0), f32 b3 scalar."""
    d = params["w2"].shape[0]
    w3_row = params["w3"].reshape(1, d)
    w3_pad = jnp.concatenate([w3_row, jnp.zeros((7, d), w3_row.dtype)], axis=0)
    return {
        "w1": params["w1"].astype(MATMUL_DTYPE),
        "b1": params["b1"].reshape(1, d).astype(MATMUL_DTYPE),
        "w2": params["w2"].astype(MATMUL_DTYPE),
        "b2": params["b2"].reshape(1, d).astype(MATMUL_DTYPE),
        "w3": w3_pad.astype(MATMUL_DTYPE),                   # (8, d)
        "b3": params["b3"].astype(jnp.float32),              # (1,) in SMEM
    }


def _ref_forward(x, params):
    """Pure-JAX f32 reference of ZDiscriminator.forward."""
    lrelu = lambda v: jnp.maximum(v, LRELU_SLOPE * v)
    h = lrelu(x @ params["w1"] + params["b1"])
    h = lrelu(h @ params["w2"] + params["b2"])
    z = h @ params["w3"] + params["b3"]
    return jax.nn.sigmoid(z)


if __name__ == "__main__":
    key = jax.random.PRNGKey(0)
    k_params, k_x, k_x2 = jax.random.split(key, 3)

    batch, z_size, d = 2, 32, 128     # small shapes; d=128 is the module default
    params = init_params(k_params, z_size=z_size, d=d)
    packed = pack_params(params)

    # Small-batch path (single tile, ragged rows).
    x = jax.random.normal(k_x, (batch, z_size), jnp.float32)
    out = jax.block_until_ready(zdiscriminator_forward(x, packed))
    assert out.shape == (batch, 1), out.shape
    assert out.dtype == jnp.float32
    assert bool(jnp.all((out >= 0.0) & (out <= 1.0)))

    ref = jax.block_until_ready(_ref_forward(x, params))
    assert bool(jnp.allclose(out, ref, atol=2e-3)), (out, ref)

    # Multi-tile "parallel" grid + ragged last tile (B=200, tm=128 -> 2 steps).
    x2 = jax.random.normal(k_x2, (200, z_size), jnp.float32)
    out2 = jax.block_until_ready(zdiscriminator_forward(x2, packed))
    ref2 = jax.block_until_ready(_ref_forward(x2, params))
    assert out2.shape == (200, 1)
    assert bool(jnp.allclose(out2, ref2, atol=2e-3))

    print("KERNEL_OK")
</pallas_src>

<mosaic_0001>
module attributes {stable_mosaic.version = 11 : i64} {
  func.func @_zdisc_kernel(%arg0: i32, %arg1: memref<128x32xf32, #tpu.memory_space<vmem>>, %arg2: memref<32x128xbf16, #tpu.memory_space<vmem>>, %arg3: memref<1x128xbf16, #tpu.memory_space<vmem>>, %arg4: memref<128x128xbf16, #tpu.memory_space<vmem>>, %arg5: memref<1x128xbf16, #tpu.memory_space<vmem>>, %arg6: memref<8x128xbf16, #tpu.memory_space<vmem>>, %arg7: memref<1xf32, #tpu.memory_space<smem>>, %arg8: memref<1x128xf32, #tpu.memory_space<vmem>>) attributes {dimension_semantics = [#tpu.dimension_semantics<parallel>], iteration_bounds = array<i64: 1>, scalar_prefetch = 0 : i64, scratch_operands = 0 : i64, tpu.core_type = #tpu.core_type<tc>, window_params = [{transform_indices = @transform_0, window_bounds = array<i64: 128, 32>}, {pipeline_mode = #tpu.pipeline_mode<synchronous>, transform_indices = @transform_1, window_bounds = array<i64: 32, 128>}, {pipeline_mode = #tpu.pipeline_mode<synchronous>, transform_indices = @transform_2, window_bounds = array<i64: 1, 128>}, {pipeline_mode = #tpu.pipeline_mode<synchronous>, transform_indices = @transform_3, window_bounds = array<i64: 128, 128>}, {pipeline_mode = #tpu.pipeline_mode<synchronous>, transform_indices = @transform_4, window_bounds = array<i64: 1, 128>}, {pipeline_mode = #tpu.pipeline_mode<synchronous>, transform_indices = @transform_5, window_bounds = array<i64: 8, 128>}, {transform_indices = @transform_6, window_bounds = array<i64: 1>}, {transform_indices = @transform_7, window_bounds = array<i64: 1, 128>}]} {
    %c0 = arith.constant 0 : index
    %c0_0 = arith.constant 0 : index
    %0 = vector.load %arg1[%c0, %c0_0] : memref<128x32xf32, #tpu.memory_space<vmem>>, vector<128x32xf32>
    %1 = arith.truncf %0 : vector<128x32xf32> to vector<128x32xbf16>
    %c0_1 = arith.constant 0 : index
    %c0_2 = arith.constant 0 : index
    %2 = vector.load %arg2[%c0_1, %c0_2] : memref<32x128xbf16, #tpu.memory_space<vmem>>, vector<32x128xbf16>
    %cst = arith.constant dense<0.000000e+00> : vector<128x128xf32>
    %3 = tpu.matmul %1, %2, %cst {dimension_numbers = #tpu.dot_dimension_numbers<[1], [0], [0], [1], [0, 0, 1, 1], [], []>} : vector<128x32xbf16>, vector<32x128xbf16>, vector<128x128xf32> -> vector<128x128xf32>
    %4 = arith.truncf %3 : vector<128x128xf32> to vector<128x128xbf16>
    %c0_3 = arith.constant 0 : index
    %c0_4 = arith.constant 0 : index
    %5 = vector.load %arg3[%c0_3, %c0_4] : memref<1x128xbf16, #tpu.memory_space<vmem>>, vector<1x128xbf16>
    %6 = vector.broadcast %5 : vector<1x128xbf16> to vector<128x128xbf16>
    %7 = arith.addf %4, %6 : vector<128x128xbf16>
    %cst_5 = arith.constant 2.001950e-01 : bf16
    %8 = vector.broadcast %cst_5 : bf16 to vector<128x128xbf16>
    %9 = arith.mulf %8, %7 : vector<128x128xbf16>
    %10 = arith.maximumf %7, %9 : vector<128x128xbf16>
    %c0_6 = arith.constant 0 : index
    %c0_7 = arith.constant 0 : index
    %11 = vector.load %arg4[%c0_6, %c0_7] : memref<128x128xbf16, #tpu.memory_space<vmem>>, vector<128x128xbf16>
    %cst_8 = arith.constant dense<0.000000e+00> : vector<128x128xf32>
    %12 = tpu.matmul %10, %11, %cst_8 {dimension_numbers = #tpu.dot_dimension_numbers<[1], [0], [0], [1], [0, 0, 1, 1], [], []>} : vector<128x128xbf16>, vector<128x128xbf16>, vector<128x128xf32> -> vector<128x128xf32>
    %13 = arith.truncf %12 : vector<128x128xf32> to vector<128x128xbf16>
    %c0_9 = arith.constant 0 : index
    %c0_10 = arith.constant 0 : index
    %14 = vector.load %arg5[%c0_9, %c0_10] : memref<1x128xbf16, #tpu.memory_space<vmem>>, vector<1x128xbf16>
    %15 = vector.broadcast %14 : vector<1x128xbf16> to vector<128x128xbf16>
    %16 = arith.addf %13, %15 : vector<128x128xbf16>
    %cst_11 = arith.constant 2.001950e-01 : bf16
    %17 = vector.broadcast %cst_11 : bf16 to vector<128x128xbf16>
    %18 = arith.mulf %17, %16 : vector<128x128xbf16>
    %19 = arith.maximumf %16, %18 : vector<128x128xbf16>
    %c0_12 = arith.constant 0 : index
    %c0_13 = arith.constant 0 : index
    %20 = vector.load %arg6[%c0_12, %c0_13] : memref<8x128xbf16, #tpu.memory_space<vmem>>, vector<8x128xbf16>
    "tpu.trace_start"() <{level = 10 : i32, message = "od,td->ot"}> : () -> ()
    %cst_14 = arith.constant dense<0.000000e+00> : vector<8x128xf32>
    %21 = tpu.matmul %20, %19, %cst_14 {dimension_numbers = #tpu.dot_dimension_numbers<[1], [1], [0], [0], [0, 0, 1, 0], [], []>} : vector<8x128xbf16>, vector<128x128xbf16>, vector<8x128xf32> -> vector<8x128xf32>
    "tpu.trace_stop"() : () -> ()
    %22 = vector.extract_strided_slice %21 {offsets = [0, 0], sizes = [1, 128], strides = [1, 1]} : vector<8x128xf32> to vector<1x128xf32>
    %c0_15 = arith.constant 0 : index
    %23 = memref.load %arg7[%c0_15] : memref<1xf32, #tpu.memory_space<smem>>
    %24 = vector.broadcast %23 : f32 to vector<1x128xf32>
    %25 = arith.addf %22, %24 : vector<1x128xf32>
    %26 = arith.negf %25 : vector<1x128xf32>
    %27 = math.exp %26 : vector<1x128xf32>
    %cst_16 = arith.constant 1.000000e+00 : f32
    %28 = vector.broadcast %cst_16 : f32 to vector<1x128xf32>
    %29 = arith.addf %28, %27 : vector<1x128xf32>
    %30 = arith.divf %28, %29 : vector<1x128xf32>
    %c0_17 = arith.constant 0 : index
    %c0_18 = arith.constant 0 : index
    %31 = vector.load %arg8[%c0_17, %c0_18] : memref<1x128xf32, #tpu.memory_space<vmem>>, vector<1x128xf32>
    tpu.vector_store %arg8[%c0_17, %c0_18], %30 {strides = array<i32>} : memref<1x128xf32, #tpu.memory_space<vmem>>, vector<1x128xf32>,
    return
  }
  func.func @transform_0(%arg0: i32) -> (i32, i32) {
    %c0_i32 = arith.constant 0 : i32
    %c0_i32_0 = arith.constant 0 : i32
    return %arg0, %c0_i32 : i32, i32
  }
  func.func @transform_1(%arg0: i32) -> (i32, i32) {
    %c0_i32 = arith.constant 0 : i32
    %c0_i32_0 = arith.constant 0 : i32
    %c0_i32_1 = arith.constant 0 : i32
    return %c0_i32, %c0_i32_0 : i32, i32
  }
  func.func @transform_2(%arg0: i32) -> (i32, i32) {
    %c0_i32 = arith.constant 0 : i32
    %c0_i32_0 = arith.constant 0 : i32
    %c0_i32_1 = arith.constant 0 : i32
    return %c0_i32, %c0_i32_0 : i32, i32
  }
  func.func @transform_3(%arg0: i32) -> (i32, i32) {
    %c0_i32 = arith.constant 0 : i32
    %c0_i32_0 = arith.constant 0 : i32
    %c0_i32_1 = arith.constant 0 : i32
    return %c0_i32, %c0_i32_0 : i32, i32
  }
  func.func @transform_4(%arg0: i32) -> (i32, i32) {
    %c0_i32 = arith.constant 0 : i32
    %c0_i32_0 = arith.constant 0 : i32
    %c0_i32_1 = arith.constant 0 : i32
    return %c0_i32, %c0_i32_0 : i32, i32
  }
  func.func @transform_5(%arg0: i32) -> (i32, i32) {
    %c0_i32 = arith.constant 0 : i32
    %c0_i32_0 = arith.constant 0 : i32
    %c0_i32_1 = arith.constant 0 : i32
    return %c0_i32, %c0_i32_0 : i32, i32
  }
  func.func @transform_6(%arg0: i32) -> i32 {
    %c0_i32 = arith.constant 0 : i32
    %c0_i32_0 = arith.constant 0 : i32
    return %c0_i32 : i32
  }
  func.func @transform_7(%arg0: i32) -> (i32, i32) {
    %c0_i32 = arith.constant 0 : i32
    %c0_i32_0 = arith.constant 0 : i32
    return %arg0, %c0_i32 : i32, i32
  }
}

</mosaic_0001>

<bundles_post_ra>
// kernel: zdiscriminator_forward.1
= control target key start
LH: loop header
LB: loop body
LE: loop exit
PB: predicated region body
PF: predicated region fallthrough
CT: control target
= control target key end

     0   :  { %13 = vsyncpa [#allocation4], 0  ;;  %s868_s0 = inlined_call_operand.vmem [shape: f32[2,32], index: 0, kind: input, shape index: {}]   ;;  %s869_s1 = inlined_call_operand.hbm [shape: bf16[32,128], index: 1, kind: input, shape index: {}]   ;;  %s870_s2 = inlined_call_operand.vmem [shape: bf16[1,128], index: 2, kind: input, shape index: {}]   ;;  %s871_s3 = inlined_call_operand.hbm [shape: bf16[128,128], index: 3, kind: input, shape index: {}]   ;;  %s872_s4 = inlined_call_operand.vmem [shape: bf16[1,128], index: 4, kind: input, shape index: {}]   ;;  %s873_s5 = inlined_call_operand.vmem [shape: bf16[8,128], index: 5, kind: input, shape index: {}]   ;;  %s874_s6 = inlined_call_operand.<no memory space> [shape: f32[1], index: 6, kind: input, shape index: {}]   ;;  %s875_s7 = inlined_call_operand.vmem [shape: f32[1,128], index: 7, kind: output, shape index: {}]  }
   0x1   :  { %14 = vsyncpa [#allocation6], 0  ;;  %s711_s24 = smov [#allocation3]   ;;  %s663_s28 = scalar_lea.hbm %s869_s1, 256 }
   0x2   :  { %s22_s25 = sshll.u32 %s711_s24, 4  ;;  %p664_p0 = scmp.ne.s32.totalorder %s869_s1, %s663_s28  ;;  %s23_s25 = int_to_ptr.vmem [resolvable:$true] %s22_s25 }
   0x3   :  { %p667_p1 = scmp.lt.u32.totalorder %s663_s28, %s869_s1 }
   0x5   :  { %p669_p2 = pnand %p667_p1, %p664_p0 }
   0x7   :  { %672 = shalt.err (!%p669_p2)
}
   0x8   :  { %s673_s10 = scalar_lea.vmem %s23_s25, 256  ;;  %p678_p4 = scmp.lt.s32.totalorder %s23_s25, %s23_s25 }
   0x9   :  { %p674_p3 = scmp.ne.s32.totalorder %s23_s25, %s673_s10  ;;  %p679_p5 = scmp.lt.s32.totalorder %s673_s10, %s673_s10 }
   0xb   :  { %p680_p6 = por %p679_p5, %p678_p4 }
   0xd   :  { %p681_p7 = pnand %p680_p6, %p674_p3 }
   0xf   :  { %684 = shalt.err (!%p681_p7)
}
  0x10   :  { %s712_s11 = smov 64   ;;  %s713_s12 = smov 4  }
  0x11   :  { %28 = dma.hbm_to_vmem [thread:$0]  %s869_s1, 256, %s23_s25, [#allocation4], %s712_s11, %s712_s11, %s713_s12  }
  0x12   :  { %s714_s15 = smov [#allocation5]   ;;  %s685_s19 = scalar_lea.hbm %s871_s3, 1024 }
  0x13   :  { %s36_s16 = sshll.u32 %s714_s15, 4  ;;  %p686_p8 = scmp.ne.s32.totalorder %s871_s3, %s685_s19  ;;  %s37_s16 = int_to_ptr.vmem [resolvable:$true] %s36_s16 }
  0x14   :  { %p689_p9 = scmp.lt.u32.totalorder %s685_s19, %s871_s3 }
  0x16   :  { %p691_p10 = pnand %p689_p9, %p686_p8 }
  0x18   :  { %694 = shalt.err (!%p691_p10)
}
  0x19   :  { %s695_s24 = scalar_lea.vmem %s37_s16, 1024  ;;  %p700_p12 = scmp.lt.s32.totalorder %s37_s16, %s37_s16 }
  0x1a   :  { %p696_p11 = scmp.ne.s32.totalorder %s37_s16, %s695_s24  ;;  %p701_p13 = scmp.lt.s32.totalorder %s695_s24, %s695_s24 }
  0x1c   :  { %p702_p0 = por %p701_p13, %p700_p12 }
  0x1e   :  { %p703_p1 = pnand %p702_p0, %p696_p11 }
  0x20   :  { %706 = shalt.err (!%p703_p1)
}
  0x21   :  { %42 = dma.hbm_to_vmem [thread:$0]  %s871_s3, 1024, %s37_s16, [#allocation6], %s712_s11, %s712_s11, %s713_s12  }
  0x22   :  { %707 = dma.done.wait [#allocation4], 256  }
  0x23   :  { %708 = vsyncadd [#allocation4], 4294967040 }
  0x24   :  { %709 = dma.done.wait [#allocation6], 1024  }
  0x25   :  { %710 = vsyncadd [#allocation6], 4294966272  ;;  %v649_v0 = vld [vmem:[#allocation3] sm:$0xff]   ;;  %v650_v1 = vld [vmem:[#allocation3 + $0x8] sm:$0xff]   ;;  %vm97_vm0 = vcmask 261120   ;;  %v231_v34 = vlaneseq  ;;  %vm716_vm1 = vmmov 0  }
  0x26   :  { %571 = vmatprep.subr.bf16.mxu1 %v649_v0  ;;  %v57_v2 = vld [vmem:[%s868_s0] sm:$0xff]  ;;  %v58_v3 = vld [vmem:[%s868_s0 + $0x8] sm:$0xff]  ;;  %v59_v5 = vld [vmem:[%s868_s0 + $0x10] sm:$0xff] }
  0x27   :  { %572 = vmatpush3.bf16.msra.mxu1 %v649_v0  ;;  %v73_v4 = vpack.c.bf16 %v58_v3, %v57_v2  ;;  %v60_v6 = vld [vmem:[%s868_s0 + $0x18] sm:$0xff]  ;;  %v61_v7 = vld [vmem:[%s868_s0 + $0x20] sm:$0xff]  ;;  %v62_v8 = vld [vmem:[%s868_s0 + $0x28] sm:$0xff]  ;;  %v837_v35 = vshrl.u32 %v231_v34, 7 }
  0x28   :  { %573 = vmatprep.subr.bf16.mxu1 %v650_v1  ;;  %v74_v9 = vpack.c.bf16 %v60_v6, %v59_v5  ;;  %v75_v10 = vpack.c.bf16 %v62_v8, %v61_v7  ;;  %v651_v11 = vld [vmem:[#allocation5] sm:$0xff]   ;;  %v64_v13 = vld [vmem:[%s868_s0 + $0x38] sm:$0xff]  ;;  %v65_v15 = vld [vmem:[%s868_s0 + $0x40] sm:$0xff] }
  0x29   :  { %575 = vmatprep.mubr.msk.bf16.mxu1 %vm97_vm0, %v73_v4  ;;  %v63_v12 = vld [vmem:[%s868_s0 + $0x30] sm:$0xff]  ;;  %v652_v14 = vld [vmem:[#allocation5 + $0x8] sm:$0xff]   ;;  %v66_v16 = vld [vmem:[%s868_s0 + $0x48] sm:$0xff]  ;;  %v233_v38 = vsub.s32 0, %v837_v35 }
  0x2a   :  { %v653_v17 = vld [vmem:[#allocation5 + $0x10] sm:$0xff]   ;;  %v76_v18 = vpack.c.bf16 %v64_v13, %v63_v12  ;;  %v77_v19 = vpack.c.bf16 %v66_v16, %v65_v15  ;;  %v654_v20 = vld [vmem:[#allocation5 + $0x18] sm:$0xff]   ;;  %v67_v21 = vld [vmem:[%s868_s0 + $0x50] sm:$0xff] }
  0x2b   :  { %574 = vmatpush3.bf16.msra.mxu1 %v650_v1  ;;  %v68_v22 = vld [vmem:[%s868_s0 + $0x58] sm:$0xff]  ;;  %v69_v23 = vld [vmem:[%s868_s0 + $0x60] sm:$0xff]  ;;  %v70_v24 = vld [vmem:[%s868_s0 + $0x68] sm:$0xff] }
  0x2c   :  { %591 = vmatprep.subr.bf16.mxu1 %v651_v11  ;;  %v655_v25 = vld [vmem:[#allocation5 + $0x20] sm:$0xff]   ;;  %v78_v26 = vpack.c.bf16 %v68_v22, %v67_v21  ;;  %v79_v27 = vpack.c.bf16 %v70_v24, %v69_v23  ;;  %v72_v29 = vld [vmem:[%s868_s0 + $0x78] sm:$0xff]  ;;  %v657_v32 = vld [vmem:[#allocation5 + $0x30] sm:$0xff]   ;;  %v715_v24 = vmov 0.0  }
  0x2d   :  { %v71_v28 = vld [vmem:[%s868_s0 + $0x70] sm:$0xff]  ;;  %v656_v31 = vld [vmem:[#allocation5 + $0x28] sm:$0xff]   ;;  %v658_v33 = vld [vmem:[#allocation5 + $0x38] sm:$0xff]   ;;  %623 = vmatprep.subr.bf16.mxu0 %v715_v24  ;;  %639 = vmatprep.mubr.msk.bf16.mxu0 %vm716_vm1, %v715_v24 }
  0x2e   :  { %576 = vmatmul.mubr.msk.bf16.vlgmr.msra.gmra.mrb[0].mxu1 %vm97_vm0, %v74_v9  ;;  %v80_v30 = vpack.c.bf16 %v72_v29, %v71_v28  ;;  %v227_v36 = vld [vmem:[%s870_s2] sm:$0x1] }
  0x2f   :  { %579 = vmatprep.mubr.msk.bf16.mxu1 %vm97_vm0, %v75_v10  ;;  %592 = vmatpush3.bf16.msra.mxu1 %v651_v11  ;;  %v229_v37 = vpack.i.b16 %v227_v36, %v227_v36 }
  0x30   :  { %593 = vmatprep.subr.bf16.mxu1 %v652_v14 }
  0x31   :  { %v234_v41 = vrot.slane %v229_v37, %v233_v38 }
  0x33   :  { %594 = vmatpush3.bf16.msra.mxu1 %v652_v14 }
  0x34   :  { %595 = vmatprep.subr.bf16.mxu1 %v653_v17 }
  0x36   :  { %580 = vmatmul.mubr.msk.bf16.gmra.mrb[4].mxu1 %vm97_vm0, %v76_v18 }
  0x37   :  { %583 = vmatprep.mubr.msk.bf16.mxu1 %vm97_vm0, %v77_v19  ;;  %596 = vmatpush3.bf16.msra.mxu1 %v653_v17 }
  0x38   :  { %597 = vmatprep.subr.bf16.mxu1 %v654_v20 }
  0x3b   :  { %598 = vmatpush3.bf16.msra.mxu1 %v654_v20 }
  0x3c   :  { %599 = vmatprep.subr.bf16.mxu1 %v655_v25 }
  0x3e   :  { %584 = vmatmul.mubr.msk.bf16.gmra.mrb[8].mxu1 %vm97_vm0, %v78_v26 }
  0x3f   :  { %587 = vmatprep.mubr.msk.bf16.mxu1 %vm97_vm0, %v79_v27  ;;  %600 = vmatpush3.bf16.msra.mxu1 %v655_v25  ;;  %v428_v25 = vld [vmem:[%s872_s4] sm:$0x1] }
  0x40   :  { %601 = vmatprep.subr.bf16.mxu1 %v656_v31  ;;  %v430_v26 = vpack.i.b16 %v428_v25, %v428_v25 }
  0x43   :  { %602 = vmatpush3.bf16.msra.mxu1 %v656_v31 }
  0x44   :  { %603 = vmatprep.subr.bf16.mxu1 %v657_v32 }
  0x46   :  { %588 = vmatmul.mubr.msk.bf16.gmra.mrb[12].mxu1 %vm97_vm0, %v80_v30  ;;  %v435_v30 = vrot.slane %v430_v26, %v233_v38 }
  0x47   :  { %604 = vmatpush3.bf16.msra.mxu1 %v657_v32 }
  0x48   :  { %605 = vmatprep.subr.bf16.mxu1 %v658_v33 }
  0x4b   :  { %606 = vmatpush3.bf16.msra.mxu1 %v658_v33 }
 0x101   :  { %v577_v39 = vpop.f32.mrb[0].mxu1 }
 0x102   :  { %v156_v40 = vpop.f32.mrb[1].mxu1 }
 0x103   :  { %v578_v42 = vpop.f32.mrb[2].mxu1 }
 0x104   :  { %v220_v43 = vpack.c.bf16 %v578_v42, %v577_v39  ;;  %v159_v44 = vpop.f32.mrb[3].mxu1 }
 0x105   :  { %v219_v45 = vpack.c.bf16 %v159_v44, %v156_v40 }
 0x106   :  { %v236_v46 = vadd.bf16 %v234_v41, %v220_v43 }
 0x107   :  { %v235_v47 = vadd.bf16 %v234_v41, %v219_v45 }
 0x108   :  { %v244_v48 = vmul.bf16 1045249613, %v236_v46 }
 0x109   :  { %v243_v49 = vmul.bf16 1045249613, %v235_v47  ;;  %v581_v50 = vpop.f32.mrb[4].mxu1 }
 0x10a   :  { %v172_v51 = vpop.f32.mrb[5].mxu1  ;;  %v252_v54 = vmax.bf16 %v244_v48, %v236_v46 }
 0x10b   :  { %v582_v52 = vpop.f32.mrb[6].mxu1  ;;  %v251_v53 = vmax.bf16 %v243_v49, %v235_v47 }
 0x10c   :  { %v222_v55 = vpack.c.bf16 %v582_v52, %v581_v50  ;;  %v175_v56 = vpop.f32.mrb[7].mxu1 }
 0x10d   :  { %v221_v57 = vpack.c.bf16 %v175_v56, %v172_v51  ;;  %607 = vmatprep.mubr.bf16.mxu1 %v251_v53 }
 0x10e   :  { %v238_v58 = vadd.bf16 %v234_v41, %v222_v55  ;;  %608 = vmatmul.mubr.bf16.vlgmr.msra.gmra.mrb[16].mxu1 %v252_v54 }
 0x10f   :  { %v237_v59 = vadd.bf16 %v234_v41, %v221_v57 }
 0x110   :  { %v246_v60 = vmul.bf16 1045249613, %v238_v58 }
 0x111   :  { %v245_v61 = vmul.bf16 1045249613, %v237_v59  ;;  %v585_v62 = vpop.f32.mrb[8].mxu1 }
 0x112   :  { %v254_v63 = vmax.bf16 %v246_v60, %v238_v58  ;;  %v188_v0 = vpop.f32.mrb[9].mxu1 }
 0x113   :  { %v253_v1 = vmax.bf16 %v245_v61, %v237_v59  ;;  %v586_v2 = vpop.f32.mrb[10].mxu1 }
 0x114   :  { %v224_v3 = vpack.c.bf16 %v586_v2, %v585_v62  ;;  %v191_v4 = vpop.f32.mrb[11].mxu1 }
 0x115   :  { %611 = vmatprep.mubr.bf16.mxu1 %v253_v1  ;;  %v223_v5 = vpack.c.bf16 %v191_v4, %v188_v0 }
 0x116   :  { %612 = vmatmul.mubr.bf16.gmra.mrb[20].mxu1 %v254_v63  ;;  %v240_v6 = vadd.bf16 %v234_v41, %v224_v3 }
 0x117   :  { %v239_v7 = vadd.bf16 %v234_v41, %v223_v5 }
 0x118   :  { %v248_v8 = vmul.bf16 1045249613, %v240_v6 }
 0x119   :  { %v247_v9 = vmul.bf16 1045249613, %v239_v7  ;;  %v589_v10 = vpop.f32.mrb[12].mxu1 }
 0x11a   :  { %v256_v11 = vmax.bf16 %v248_v8, %v240_v6  ;;  %v204_v12 = vpop.f32.mrb[13].mxu1 }
 0x11b   :  { %v255_v13 = vmax.bf16 %v247_v9, %v239_v7  ;;  %v590_v14 = vpop.f32.mrb[14].mxu1 }
 0x11c   :  { %v226_v15 = vpack.c.bf16 %v590_v14, %v589_v10  ;;  %v207_v16 = vpop.f32.mrb[15].mxu1 }
 0x11d   :  { %615 = vmatprep.mubr.bf16.mxu1 %v255_v13  ;;  %v225_v17 = vpack.c.bf16 %v207_v16, %v204_v12  ;;  %v460_v12 = vld [vmem:[%s873_s5] sm:$0xf]  ;;  %v502_v13 = vstv %s874_s6 }
 0x11e   :  { %616 = vmatmul.mubr.bf16.gmra.mrb[24].mxu1 %v256_v11  ;;  %v242_v18 = vadd.bf16 %v234_v41, %v226_v15 }
 0x11f   :  { %v241_v19 = vadd.bf16 %v234_v41, %v225_v17 }
 0x120   :  { %v250_v20 = vmul.bf16 1045249613, %v242_v18 }
 0x121   :  { %v249_v21 = vmul.bf16 1045249613, %v241_v19 }
 0x122   :  { %v258_v22 = vmax.bf16 %v250_v20, %v242_v18 }
 0x123   :  { %v257_v23 = vmax.bf16 %v249_v21, %v241_v19 }
 0x125   :  { %619 = vmatprep.mubr.bf16.mxu1 %v257_v23 }
 0x126   :  { %620 = vmatmul.mubr.bf16.gmra.mrb[28].mxu1 %v258_v22 }
 0x1e1   :  { %v609_v27 = vpop.f32.mrb[16].mxu1 }
 0x1e2   :  { %v357_v28 = vpop.f32.mrb[17].mxu1 }
 0x1e3   :  { %v610_v29 = vpop.f32.mrb[18].mxu1 }
 0x1e4   :  { %v421_v31 = vpack.c.bf16 %v610_v29, %v609_v27  ;;  %v360_v32 = vpop.f32.mrb[19].mxu1 }
 0x1e5   :  { %v420_v33 = vpack.c.bf16 %v360_v32, %v357_v28 }
 0x1e6   :  { %v437_v40 = vadd.bf16 %v435_v30, %v421_v31 }
 0x1e7   :  { %v436_v34 = vadd.bf16 %v435_v30, %v420_v33 }
 0x1e8   :  { %v445_v46 = vmul.bf16 1045249613, %v437_v40 }
 0x1e9   :  { %v613_v36 = vpop.f32.mrb[20].mxu1  ;;  %v444_v37 = vmul.bf16 1045249613, %v436_v34 }
 0x1ea   :  { %v373_v39 = vpop.f32.mrb[21].mxu1  ;;  %v453_v48 = vmax.bf16 %v445_v46, %v437_v40 }
 0x1eb   :  { %v614_v41 = vpop.f32.mrb[22].mxu1  ;;  %v452_v42 = vmax.bf16 %v444_v37, %v436_v34 }
 0x1ec   :  { %v423_v43 = vpack.c.bf16 %v614_v41, %v613_v36  ;;  %v376_v44 = vpop.f32.mrb[23].mxu1 }
 0x1ed   :  { %v422_v45 = vpack.c.bf16 %v376_v44, %v373_v39  ;;  %624 = vmatpush3.bf16.xpose.msra.mxu0 %v452_v42 }
 0x1ee   :  { %625 = vmatprep.subr.bf16.mxu0 %v715_v24  ;;  %v439_v56 = vadd.bf16 %v435_v30, %v423_v43 }
 0x1ef   :  { %v438_v38 = vadd.bf16 %v435_v30, %v422_v45 }
 0x1f0   :  { %v447_v62 = vmul.bf16 1045249613, %v439_v56 }
 0x1f1   :  { %v617_v47 = vpop.f32.mrb[24].mxu1  ;;  %v446_v53 = vmul.bf16 1045249613, %v438_v38 }
 0x1f2   :  { %v389_v35 = vpop.f32.mrb[25].mxu1  ;;  %v455_v0 = vmax.bf16 %v447_v62, %v439_v56 }
 0x1f3   :  { %v618_v49 = vpop.f32.mrb[26].mxu1  ;;  %v454_v57 = vmax.bf16 %v446_v53, %v438_v38 }
 0x1f4   :  { %v425_v50 = vpack.c.bf16 %v618_v49, %v617_v47  ;;  %v392_v51 = vpop.f32.mrb[27].mxu1 }
 0x1f5   :  { %626 = vmatpush3.bf16.xpose.msra.mxu0 %v453_v48  ;;  %v424_v52 = vpack.c.bf16 %v392_v51, %v389_v35 }
 0x1f6   :  { %627 = vmatprep.subr.bf16.mxu0 %v715_v24  ;;  %v441_v2 = vadd.bf16 %v435_v30, %v425_v50 }
 0x1f7   :  { %v440_v63 = vadd.bf16 %v435_v30, %v424_v52 }
 0x1f8   :  { %v449_v4 = vmul.bf16 1045249613, %v441_v2 }
 0x1f9   :  { %v621_v54 = vpop.f32.mrb[28].mxu1  ;;  %v448_v1 = vmul.bf16 1045249613, %v440_v63 }
 0x1fa   :  { %v405_v55 = vpop.f32.mrb[29].mxu1  ;;  %v457_v6 = vmax.bf16 %v449_v4, %v441_v2 }
 0x1fb   :  { %v622_v58 = vpop.f32.mrb[30].mxu1  ;;  %v456_v3 = vmax.bf16 %v448_v1, %v440_v63 }
 0x1fc   :  { %v427_v59 = vpack.c.bf16 %v622_v58, %v621_v54  ;;  %v408_v60 = vpop.f32.mrb[31].mxu1 }
 0x1fd   :  { %628 = vmatpush3.bf16.xpose.msra.mxu0 %v454_v57  ;;  %v426_v61 = vpack.c.bf16 %v408_v60, %v405_v55 }
 0x1fe   :  { %629 = vmatprep.subr.bf16.mxu0 %v715_v24  ;;  %v443_v8 = vadd.bf16 %v435_v30, %v427_v59 }
 0x1ff   :  { %v442_v5 = vadd.bf16 %v435_v30, %v426_v61 }
 0x200   :  { %v451_v10 = vmul.bf16 1045249613, %v443_v8 }
 0x201   :  { %v450_v7 = vmul.bf16 1045249613, %v442_v5 }
 0x202   :  { %v459_v11 = vmax.bf16 %v451_v10, %v443_v8 }
 0x203   :  { %v458_v9 = vmax.bf16 %v450_v7, %v442_v5 }
 0x205   :  { %630 = vmatpush3.bf16.xpose.msra.mxu0 %v455_v0 }
 0x206   :  { %631 = vmatprep.subr.bf16.mxu0 %v715_v24 }
 0x20d   :  { %632 = vmatpush3.bf16.xpose.msra.mxu0 %v456_v3 }
 0x20e   :  { %633 = vmatprep.subr.bf16.mxu0 %v715_v24 }
 0x215   :  { %634 = vmatpush3.bf16.xpose.msra.mxu0 %v457_v6 }
 0x216   :  { %635 = vmatprep.subr.bf16.mxu0 %v715_v24 }
 0x21d   :  { %636 = vmatpush3.bf16.xpose.msra.mxu0 %v458_v9 }
 0x21e   :  { %637 = vmatprep.subr.bf16.mxu0 %v715_v24 }
 0x225   :  { %638 = vmatpush3.bf16.xpose.msra.mxu0 %v459_v11 }
 0x22c   :  { %640 = vmatmul.mubr.bf16.vlgmr.msra.gmra.mrb[0].mxu0 %v460_v12 }
 0x2ff   :  { %v495_v14 = vpop.f32.mrb[0].mxu0 }
 0x300   :  { %v503_v15 = vadd.f32 %v502_v13, %v495_v14  ;;  %v641_v16 = vpop.f32.mrb[1].mxu0 }
 0x301   :  { %v498_v17 = vpop.f32.mrb[2].mxu0 }
 0x302   :  { %v535_v18 = vmul.f32 -1.442695, %v503_v15  ;;  %v642_v19 = vpop.f32.mrb[3].mxu0 }
 0x304   :  { %659 = vpow2.f32 %v535_v18 }
 0x30e   :  { %v660_v20 = vpop.eup %659 }
 0x30f   :  { %v507_v21 = vadd.f32 1.0, %v660_v20 }
 0x311   :  { %661 = vrcp.f32 %v507_v21 }
 0x31b   :  { %v662_v22 = vpop.eup %661 }
 0x31c   :  { %510 = vst [vmem:[%s875_s7] sm:$0x1] %v662_v22 }
 0x31d   :  { %515 = vsyncpa [#allocation4], 1 }
 0x31e   :  { %516 = vsyncpa [#allocation6], 1 }

</bundles_post_ra>
